<compile_context>
chip_gen: v5e
topology: v5e:2x2
jax: 0.10.0
libtpu: 0.0.40
codegen_flags: <defaults>
</compile_context>

<pallas_src>
import math

import jax
import jax.numpy as jnp
from jax.experimental import pallas as pl
from jax.experimental.pallas import tpu as pltpu

LANES = 128
_TARGET_BLOCK_BYTES = 4 * 1024 * 1024   # ~4 MiB per buffered tile (all gens)
_VMEM_LIMIT_BYTES = 40 << 20            # 2 bufs x (in + out) x 4 MiB = 16 MiB << 40 MiB
_SUBLANE_MULTIPLE = 32                  # covers sublane packing for 4/2/1-byte dtypes


def _copy_kernel(x_ref, o_ref):
    # Pure VMEM tile copy; all HBM<->VMEM movement is done by BlockSpec DMAs.
    o_ref[...] = x_ref[...]


def _resolve_shape(total, shape):
    """torch .view()-style shape resolution (supports a single -1)."""
    shape = list(shape)
    neg = [i for i, s in enumerate(shape) if s == -1]
    if len(neg) > 1:
        raise ValueError("only one dimension can be -1")
    known = 1
    for s in shape:
        if s != -1:
            known *= int(s)
    if neg:
        if known == 0 or total % known != 0:
            raise ValueError(f"cannot reshape {total} elements into {shape}")
        shape[neg[0]] = total // known
    if math.prod(shape) != total:
        raise ValueError(f"cannot reshape {total} elements into {tuple(shape)}")
    return tuple(int(s) for s in shape)


def _pick_row_block(rows, itemsize):
    """Fixed large row block (~4 MiB tile). No divisor search: the grid uses
    cdiv, so the final block may be ragged and Pallas masks it for us."""
    big = max(_SUBLANE_MULTIPLE, _TARGET_BLOCK_BYTES // (LANES * itemsize))
    big -= big % _SUBLANE_MULTIPLE      # keep sublane-packing alignment
    if rows <= big:
        # Single block covering the whole array (block dim == array dim is
        # always a legal tiling, regardless of the (8,128) rule).
        return rows
    return big


def _flat_copy(flat, donate=False):
    """Pallas copy of a 1-D array, returned as a new 1-D array."""
    (total,) = flat.shape
    dtype = flat.dtype
    itemsize = jnp.dtype(dtype).itemsize
    # TODO(synk): sub-byte dtypes (e.g. int4) would need a bitcast to a
    # byte-wide container before tiling; not needed for this module's usage.

    # Pad to a lane multiple in the wrapper (layout plumbing) so the kernel
    # only ever sees full, unmasked 128-lane rows -- this replaces the old
    # single (1, total) full-extent fallback block, which could OOM VMEM for
    # large non-aligned inputs.
    pad = (-total) % LANES
    if pad:
        flat = jnp.pad(flat, (0, pad))
    padded = total + pad
    rows = padded // LANES

    row_block = _pick_row_block(rows, itemsize)
    grid = (pl.cdiv(rows, row_block),)

    x2d = flat.reshape(rows, LANES)     # lane-dense view: every row = 128 full lanes
    out = pl.pallas_call(
        _copy_kernel,
        out_shape=jax.ShapeDtypeStruct((rows, LANES), dtype),
        grid_spec=pltpu.PrefetchScalarGridSpec(
            num_scalar_prefetch=0,
            grid=grid,
            in_specs=[pl.BlockSpec((row_block, LANES), lambda i: (i, 0))],
            out_specs=pl.BlockSpec((row_block, LANES), lambda i: (i, 0)),
        ),
        compiler_params=pltpu.CompilerParams(
            dimension_semantics=("parallel",),
            vmem_limit_bytes=_VMEM_LIMIT_BYTES,
        ),
        cost_estimate=pl.CostEstimate(
            flops=0, transcendentals=0, bytes_accessed=2 * padded * itemsize),
        input_output_aliases=({0: 0} if donate else {}),
    )(x2d)

    out_flat = out.reshape(padded)
    if pad:
        out_flat = out_flat[:total]
    return out_flat


def reshape(x, *shape, donate=False):
    """Pallas implementation of `x.view(shape)` (PyTorch Reshape.forward).

    `donate=True` aliases the input buffer into the output (torch .view
    aliases storage anyway); keep False if the input is reused afterwards.
    """
    total = int(x.size)
    out_shape = _resolve_shape(total, shape)
    if total == 0:
        return jnp.reshape(x, out_shape)          # nothing to copy
    # Wrapper-side flatten / final reshape are free layout plumbing; the Pallas
    # kernel does the (contiguous, lane-dense) data movement.
    flat = x.reshape(total)
    return _flat_copy(flat, donate=donate).reshape(out_shape)


class Reshape:
    """Mirror of the PyTorch module: Reshape(*args)(x) == x.view(*args)."""

    def __init__(self, *args):
        if len(args) == 1 and isinstance(args[0], (tuple, list)):
            args = tuple(args[0])
        self.shape = args

    def __call__(self, x):
        return reshape(x, *self.shape)


if __name__ == "__main__":
    key = jax.random.PRNGKey(0)
    # Matches the VAE usage pattern: a flat linear activation reshaped back to
    # (N, C, H, W) before the decoder convs.  Small: batch=2, C=4, 16x16.
    x = jax.random.normal(key, (2, 4 * 16 * 16), dtype=jnp.float32)

    module = Reshape(-1, 4, 16, 16)
    out = module(x)
    jax.block_until_ready(out)

    ref = jnp.reshape(x, (2, 4, 16, 16))
    assert out.shape == (2, 4, 16, 16)
    assert out.dtype == x.dtype
    assert jnp.array_equal(out, ref)

    # Exercise the non-lane-aligned path (total = 105 elements -> pad & slice).
    y = jax.random.normal(jax.random.PRNGKey(1), (3, 5, 7), dtype=jnp.float32)
    out2 = Reshape(-1, 35)(y)
    jax.block_until_ready(out2)
    assert out2.shape == (3, 35)
    assert jnp.array_equal(out2, jnp.reshape(y, (3, 35)))

    # Exercise a bf16 input (different sublane packing) at a small size.
    z = jax.random.normal(jax.random.PRNGKey(2), (2, 8, 32), dtype=jnp.bfloat16)
    out3 = Reshape(2, 256)(z)
    jax.block_until_ready(out3)
    assert out3.shape == (2, 256)
    assert jnp.array_equal(out3, jnp.reshape(z, (2, 256)))

    print("KERNEL_OK")
</pallas_src>

<mosaic_0001>
module attributes {stable_mosaic.version = 11 : i64} {
  func.func @_copy_kernel(%arg0: i32, %arg1: memref<16x128xf32, #tpu.memory_space<vmem>>, %arg2: memref<16x128xf32, #tpu.memory_space<vmem>>) attributes {dimension_semantics = [#tpu.dimension_semantics<parallel>], iteration_bounds = array<i64: 1>, scalar_prefetch = 0 : i64, scratch_operands = 0 : i64, tpu.core_type = #tpu.core_type<tc>, window_params = [{transform_indices = @transform_0, window_bounds = array<i64: 16, 128>}, {transform_indices = @transform_1, window_bounds = array<i64: 16, 128>}]} {
    %c0 = arith.constant 0 : index
    %c0_0 = arith.constant 0 : index
    %0 = vector.load %arg1[%c0, %c0_0] : memref<16x128xf32, #tpu.memory_space<vmem>>, vector<16x128xf32>
    %c0_1 = arith.constant 0 : index
    %c0_2 = arith.constant 0 : index
    %1 = vector.load %arg2[%c0_1, %c0_2] : memref<16x128xf32, #tpu.memory_space<vmem>>, vector<16x128xf32>
    tpu.vector_store %arg2[%c0_1, %c0_2], %0 {strides = array<i32>} : memref<16x128xf32, #tpu.memory_space<vmem>>, vector<16x128xf32>,
    return
  }
  func.func @transform_0(%arg0: i32) -> (i32, i32) {
    %c0_i32 = arith.constant 0 : i32
    %c0_i32_0 = arith.constant 0 : i32
    return %arg0, %c0_i32 : i32, i32
  }
  func.func @transform_1(%arg0: i32) -> (i32, i32) {
    %c0_i32 = arith.constant 0 : i32
    %c0_i32_0 = arith.constant 0 : i32
    return %arg0, %c0_i32 : i32, i32
  }
}

</mosaic_0001>

<bundles_post_ra>
// kernel: tpu_custom_call.1
= control target key start
LH: loop header
LB: loop body
LE: loop exit
PB: predicated region body
PF: predicated region fallthrough
CT: control target
= control target key end

     0   :  { %6 = vsyncpa [#allocation3], 0  ;;  %s124_s0 = inlined_call_operand.hbm [shape: f32[16,128], index: 0, kind: input, shape index: {}]   ;;  %s125_s1 = inlined_call_operand.hbm [shape: f32[16,128], index: 1, kind: output, shape index: {}]  }
   0x1   :  { %7 = vsyncpa [#allocation4], 0  ;;  %s12_s8 = sshll.u32 %s124_s0, 4  ;;  %s104_s9 = smov [#allocation2]   ;;  %s13_s8 = int_to_ptr.hbm [resolvable:$true] %s12_s8 }
   0x2   :  { %s14_s10 = sshll.u32 %s104_s9, 4  ;;  %s105_s11 = smov 128   ;;  %s15_s10 = int_to_ptr.vmem [resolvable:$true] %s14_s10 }
   0x3   :  { %s106_s12 = smov 8  }
   0x4   :  { %20 = dma.hbm_to_vmem [thread:$0]  %s13_s8, 256, %s15_s10, [#allocation3], %s105_s11, %s105_s11, %s106_s12  }
   0x5   :  { %100 = dma.done.wait [#allocation3], 256  }
   0x6   :  { %101 = vsyncadd [#allocation3], 4294967040  ;;  %s107_s13 = smov [#allocation5]   ;;  %s35_s17 = sshll.u32 %s125_s1, 4  ;;  %v25_v0 = vld [vmem:[#allocation2] sm:$0xff]  ;;  %v26_v1 = vld [vmem:[#allocation2 + $0x8] sm:$0xff]  ;;  %s36_s17 = int_to_ptr.hbm [resolvable:$true] %s35_s17 }
   0x7   :  { %s33_s14 = sshll.u32 %s107_s13, 4  ;;  %27 = vst [vmem:[#allocation5] sm:$0xff] %v25_v0  ;;  %s34_s14 = int_to_ptr.vmem [resolvable:$true] %s33_s14 }
   0x8   :  { %28 = vst [vmem:[#allocation5 + $0x8] sm:$0xff] %v26_v1 }
   0x9   :  { %41 = dma.vmem_to_hbm [thread:$0]  %s34_s14, 256, %s36_s17, [#allocation4], %s105_s11, %s105_s11, %s106_s12  }
   0xa   :  { %102 = dma.done.wait [#allocation4], 256  }
   0xb   :  { %103 = vsyncadd [#allocation4], 4294967040 }
   0xc   :  { %46 = vsyncpa [#allocation3], 1 }
   0xd   :  { %47 = vsyncpa [#allocation4], 1 }

</bundles_post_ra>
